<compile_context>
chip_gen: v5e
topology: v5e:2x2
jax: 0.10.0
libtpu: 0.0.40
codegen_flags: <defaults>
</compile_context>

<pallas_src>
import jax
import jax.numpy as jnp
import numpy as np
from jax import lax
from jax.experimental import pallas as pl
from jax.experimental.pallas import tpu as pltpu

# The Blur module's buffer (used only by the pure-JAX reference below).
_BLUR_W = np.array([[1.0, 2.0, 1.0],
                    [2.0, 4.0, 2.0],
                    [1.0, 2.0, 1.0]], dtype=np.float32)
_BLUR_W = _BLUR_W / _BLUR_W.sum()


def _blur_kernel(x_ref, o_ref, t_ref, carry_ref):
    # x_ref     : (nb, th, W)           raw input rows of row-block min(h, nH-1)
    # o_ref     : (nb, th, W)           output rows of row-block max(h-1, 0)
    # t_ref     : (nb, th+2, W)  f32    horizontal-pass scratch
    # carry_ref : (nb, th+2, W+2) f32   carried raw rows with zero halo:
    #               row 0      : last row of block h-2  (or 0 at the top edge)
    #               rows 1..th : rows of block h-1
    #               row th+1   : first row of block h   (or 0 at the bottom edge)
    #               columns 0 and W+1 stay 0 (the 1-px zero pad along W)
    h = pl.program_id(1)
    n_h = pl.num_programs(1) - 1          # number of real row blocks
    nb, th, W = x_ref.shape

    # ---- start of a row sweep: initialise the carry (halo strips only) ----
    @pl.when(h == 0)
    def _():
        zcol = jnp.zeros((nb, th + 2, 1), jnp.float32)
        carry_ref[:, :, pl.ds(0, 1)] = zcol
        carry_ref[:, :, pl.ds(W + 1, 1)] = zcol
        carry_ref[:, pl.ds(0, 1), pl.ds(1, W)] = jnp.zeros((nb, 1, W), jnp.float32)
        carry_ref[:, pl.ds(1, th), pl.ds(1, W)] = x_ref[...].astype(jnp.float32)

    # ---- emit output for the previous row block (one block behind) --------
    @pl.when(h > 0)
    def _():
        # Bottom row halo for block h-1: first row of block h, or 0 at the end.
        @pl.when(h < n_h)
        def _():
            carry_ref[:, pl.ds(th + 1, 1), pl.ds(1, W)] = (
                x_ref[:, pl.ds(0, 1), :].astype(jnp.float32))

        @pl.when(h == n_h)
        def _():
            carry_ref[:, pl.ds(th + 1, 1), pl.ds(1, W)] = jnp.zeros(
                (nb, 1, W), jnp.float32)

        # Horizontal (1,2,1) along W: three lane-shifted reads of the carry
        # (the permanently-zero halo columns provide the padding=1 along W).
        mid_w = carry_ref[:, :, pl.ds(1, W)]
        t_ref[...] = (carry_ref[:, :, pl.ds(0, W)]
                      + (mid_w + mid_w)
                      + carry_ref[:, :, pl.ds(2, W)])

        # Vertical (1,2,1) along H: three row-shifted reads of t; single 1/16.
        mid_h = t_ref[:, pl.ds(1, th), :]
        acc = (t_ref[:, pl.ds(0, th), :]
               + (mid_h + mid_h)
               + t_ref[:, pl.ds(2, th), :]) * jnp.float32(1.0 / 16.0)
        o_ref[...] = acc.astype(o_ref.dtype)

        # Roll the carry forward: block h becomes "previous" for step h+1.
        @pl.when(h < n_h)
        def _():
            carry_ref[:, pl.ds(0, 1), pl.ds(1, W)] = (
                carry_ref[:, pl.ds(th, 1), pl.ds(1, W)])
            carry_ref[:, pl.ds(1, th), pl.ds(1, W)] = x_ref[...].astype(jnp.float32)


def _vmem_capacity_bytes():
    try:
        return int(pltpu.get_tpu_info().vmem_capacity_bytes)
    except Exception:
        return 64 * 1024 * 1024   # v7x per-core capacity: the safe lower bound


def _divisors_desc(n):
    return [d for d in range(n, 0, -1) if n % d == 0]


def _pick_tiles(N, H, W, dtype):
    """Choose (nb, th) so the per-step working set fits a generation-aware
    VMEM budget, th is sublane-aligned (or the full H), nb divides N, and the
    parallel N axis has >= 2 steps whenever N >= 2 (keeps both v7x TCs busy)."""
    itemsize = np.dtype(dtype).itemsize
    budget = _vmem_capacity_bytes() // 4

    def step_bytes(nb, th):
        io = 4 * nb * th * W * itemsize                    # 2x-buffered in + out
        scratch = nb * (th + 2) * ((W + 2) + W) * 4        # carry + t, f32
        return io + scratch

    # Row block: largest divisor of H that is a multiple of 8 (sublane tile)
    # or H itself, whose nb=1 working set fits the budget.
    cands = [d for d in _divisors_desc(H) if d == H or d % 8 == 0]
    th = cands[-1]
    for c in cands:
        if step_bytes(1, c) <= budget:
            th = c
            break

    # Channel block: largest divisor of N that fits, capped for >= 2 N-steps.
    nb_cap = max(1, N // 2)
    nb = 1
    for c in _divisors_desc(N):
        if c <= nb_cap and step_bytes(c, th) <= budget:
            nb = c
            break
    return nb, th, step_bytes(nb, th)


def blur(x):
    """Depthwise 3x3 binomial blur, padding=1.  x: (B, C, H, W) NCHW."""
    B, C, H, W = x.shape
    N = B * C
    xr = x.reshape(N, H, W)                 # free reshape, no HBM traffic

    nb, th, ws_bytes = _pick_tiles(N, H, W, x.dtype)
    n_h = H // th
    grid = (N // nb, n_h + 1)               # trailing drain step along rows

    vmem_cap = _vmem_capacity_bytes()
    vmem_limit = int(min(vmem_cap * 3 // 4,
                         max(32 * 1024 * 1024, 2 * ws_bytes)))

    out = pl.pallas_call(
        _blur_kernel,
        out_shape=jax.ShapeDtypeStruct((N, H, W), x.dtype),
        grid_spec=pltpu.PrefetchScalarGridSpec(
            num_scalar_prefetch=0,
            grid=grid,
            in_specs=[pl.BlockSpec(
                (nb, th, W), lambda n, h: (n, jnp.minimum(h, n_h - 1), 0))],
            out_specs=pl.BlockSpec(
                (nb, th, W), lambda n, h: (n, jnp.maximum(h - 1, 0), 0)),
            scratch_shapes=[
                pltpu.VMEM((nb, th + 2, W), jnp.float32),       # horizontal pass
                pltpu.VMEM((nb, th + 2, W + 2), jnp.float32),   # row carry
            ],
        ),
        compiler_params=pltpu.CompilerParams(
            dimension_semantics=("parallel", "arbitrary"),
            vmem_limit_bytes=vmem_limit,
        ),
    )(xr)

    return out.reshape(B, C, H, W)


def _blur_reference(x):
    """Pure-JAX reference: grouped conv identical to F.conv2d(..., groups=C)."""
    B, C, H, W = x.shape
    w = jnp.asarray(_BLUR_W)[None, None]          # (1,1,3,3)
    w = jnp.tile(w, (C, 1, 1, 1))                 # (C,1,3,3) like module buffer
    return lax.conv_general_dilated(
        x, w,
        window_strides=(1, 1),
        padding=((1, 1), (1, 1)),
        dimension_numbers=("NCHW", "OIHW", "NCHW"),
        feature_group_count=C,
    )


if __name__ == "__main__":
    key = jax.random.PRNGKey(0)
    B, C, H, W = 2, 4, 16, 16
    x = jax.random.normal(key, (B, C, H, W), dtype=jnp.float32)

    out = jax.block_until_ready(blur(x))

    ref = _blur_reference(x)
    assert out.shape == (B, C, H, W)
    np.testing.assert_allclose(np.asarray(out), np.asarray(ref), atol=1e-5, rtol=1e-5)

    print("KERNEL_OK")
</pallas_src>

<mosaic_0001>
module attributes {stable_mosaic.version = 11 : i64} {
  func.func @_blur_kernel(%arg0: i32, %arg1: i32, %arg2: memref<4x16x16xf32, #tpu.memory_space<vmem>>, %arg3: memref<4x16x16xf32, #tpu.memory_space<vmem>>, %arg4: memref<4x18x16xf32, #tpu.memory_space<vmem>>, %arg5: memref<4x18x18xf32, #tpu.memory_space<vmem>>) attributes {dimension_semantics = [#tpu.dimension_semantics<parallel>, #tpu.dimension_semantics<arbitrary>], iteration_bounds = array<i64: 2, 2>, scalar_prefetch = 0 : i64, scratch_operands = 2 : i64, tpu.core_type = #tpu.core_type<tc>, window_params = [{transform_indices = @transform_0, window_bounds = array<i64: 4, 16, 16>}, {transform_indices = @transform_1, window_bounds = array<i64: 4, 16, 16>}]} {
    %c0_i32 = arith.constant 0 : i32
    %0 = arith.cmpi eq, %arg1, %c0_i32 : i32
    %1 = arith.extui %0 : i1 to i32
    %c0_i32_0 = arith.constant 0 : i32
    %2 = arith.cmpi ne, %1, %c0_i32_0 : i32
    scf.if %2 {
      %cst = arith.constant 0.000000e+00 : f32
      %6 = vector.broadcast %cst : f32 to vector<4x18x1xf32>
      %c0 = arith.constant 0 : index
      %c0_3 = arith.constant 0 : index
      %c0_4 = arith.constant 0 : index
      %7 = vector.load %arg5[%c0, %c0_3, %c0_4] : memref<4x18x18xf32, #tpu.memory_space<vmem>>, vector<4x18x1xf32>
      tpu.vector_store %arg5[%c0, %c0_3, %c0_4], %6 {strides = array<i32>} : memref<4x18x18xf32, #tpu.memory_space<vmem>>, vector<4x18x1xf32>,
      %c0_5 = arith.constant 0 : index
      %c0_6 = arith.constant 0 : index
      %c17 = arith.constant 17 : index
      %8 = vector.load %arg5[%c0_5, %c0_6, %c17] : memref<4x18x18xf32, #tpu.memory_space<vmem>>, vector<4x18x1xf32>
      tpu.vector_store %arg5[%c0_5, %c0_6, %c17], %6 {strides = array<i32>} : memref<4x18x18xf32, #tpu.memory_space<vmem>>, vector<4x18x1xf32>,
      %cst_7 = arith.constant 0.000000e+00 : f32
      %9 = vector.broadcast %cst_7 : f32 to vector<4x1x16xf32>
      %c0_8 = arith.constant 0 : index
      %c0_9 = arith.constant 0 : index
      %c1 = arith.constant 1 : index
      %10 = vector.load %arg5[%c0_8, %c0_9, %c1] : memref<4x18x18xf32, #tpu.memory_space<vmem>>, vector<4x1x16xf32>
      tpu.vector_store %arg5[%c0_8, %c0_9, %c1], %9 {strides = array<i32>} : memref<4x18x18xf32, #tpu.memory_space<vmem>>, vector<4x1x16xf32>,
      %c0_10 = arith.constant 0 : index
      %c0_11 = arith.constant 0 : index
      %c0_12 = arith.constant 0 : index
      %11 = vector.load %arg2[%c0_10, %c0_11, %c0_12] : memref<4x16x16xf32, #tpu.memory_space<vmem>>, vector<4x16x16xf32>
      %c0_13 = arith.constant 0 : index
      %c1_14 = arith.constant 1 : index
      %c1_15 = arith.constant 1 : index
      %12 = vector.load %arg5[%c0_13, %c1_14, %c1_15] : memref<4x18x18xf32, #tpu.memory_space<vmem>>, vector<4x16x16xf32>
      tpu.vector_store %arg5[%c0_13, %c1_14, %c1_15], %11 {strides = array<i32>} : memref<4x18x18xf32, #tpu.memory_space<vmem>>, vector<4x16x16xf32>,
    } else {
    }
    %c0_i32_1 = arith.constant 0 : i32
    %3 = arith.cmpi sgt, %arg1, %c0_i32_1 : i32
    %4 = arith.extui %3 : i1 to i32
    %c0_i32_2 = arith.constant 0 : i32
    %5 = arith.cmpi ne, %4, %c0_i32_2 : i32
    scf.if %5 {
      %c1_i32 = arith.constant 1 : i32
      %6 = arith.cmpi slt, %arg1, %c1_i32 : i32
      %7 = arith.extui %6 : i1 to i32
      %c0_i32_3 = arith.constant 0 : i32
      %8 = arith.cmpi ne, %7, %c0_i32_3 : i32
      scf.if %8 {
        %c0_29 = arith.constant 0 : index
        %c0_30 = arith.constant 0 : index
        %c0_31 = arith.constant 0 : index
        %31 = vector.load %arg2[%c0_29, %c0_30, %c0_31] : memref<4x16x16xf32, #tpu.memory_space<vmem>>, vector<4x1x16xf32>
        %c0_32 = arith.constant 0 : index
        %c17 = arith.constant 17 : index
        %c1_33 = arith.constant 1 : index
        %32 = vector.load %arg5[%c0_32, %c17, %c1_33] : memref<4x18x18xf32, #tpu.memory_space<vmem>>, vector<4x1x16xf32>
        tpu.vector_store %arg5[%c0_32, %c17, %c1_33], %31 {strides = array<i32>} : memref<4x18x18xf32, #tpu.memory_space<vmem>>, vector<4x1x16xf32>,
      } else {
      }
      %c1_i32_4 = arith.constant 1 : i32
      %9 = arith.cmpi eq, %arg1, %c1_i32_4 : i32
      %10 = arith.extui %9 : i1 to i32
      %c0_i32_5 = arith.constant 0 : i32
      %11 = arith.cmpi ne, %10, %c0_i32_5 : i32
      scf.if %11 {
        %cst_29 = arith.constant 0.000000e+00 : f32
        %31 = vector.broadcast %cst_29 : f32 to vector<4x1x16xf32>
        %c0_30 = arith.constant 0 : index
        %c17 = arith.constant 17 : index
        %c1_31 = arith.constant 1 : index
        %32 = vector.load %arg5[%c0_30, %c17, %c1_31] : memref<4x18x18xf32, #tpu.memory_space<vmem>>, vector<4x1x16xf32>
        tpu.vector_store %arg5[%c0_30, %c17, %c1_31], %31 {strides = array<i32>} : memref<4x18x18xf32, #tpu.memory_space<vmem>>, vector<4x1x16xf32>,
      } else {
      }
      %c0 = arith.constant 0 : index
      %c0_6 = arith.constant 0 : index
      %c1 = arith.constant 1 : index
      %12 = vector.load %arg5[%c0, %c0_6, %c1] : memref<4x18x18xf32, #tpu.memory_space<vmem>>, vector<4x18x16xf32>
      %c0_7 = arith.constant 0 : index
      %c0_8 = arith.constant 0 : index
      %c0_9 = arith.constant 0 : index
      %13 = vector.load %arg5[%c0_7, %c0_8, %c0_9] : memref<4x18x18xf32, #tpu.memory_space<vmem>>, vector<4x18x16xf32>
      %14 = arith.addf %12, %12 : vector<4x18x16xf32>
      %15 = arith.addf %13, %14 : vector<4x18x16xf32>
      %c0_10 = arith.constant 0 : index
      %c0_11 = arith.constant 0 : index
      %c2 = arith.constant 2 : index
      %16 = vector.load %arg5[%c0_10, %c0_11, %c2] : memref<4x18x18xf32, #tpu.memory_space<vmem>>, vector<4x18x16xf32>
      %17 = arith.addf %15, %16 : vector<4x18x16xf32>
      %c0_12 = arith.constant 0 : index
      %c0_13 = arith.constant 0 : index
      %c0_14 = arith.constant 0 : index
      %18 = vector.load %arg4[%c0_12, %c0_13, %c0_14] : memref<4x18x16xf32, #tpu.memory_space<vmem>>, vector<4x18x16xf32>
      tpu.vector_store %arg4[%c0_12, %c0_13, %c0_14], %17 {strides = array<i32>} : memref<4x18x16xf32, #tpu.memory_space<vmem>>, vector<4x18x16xf32>,
      %c0_15 = arith.constant 0 : index
      %c1_16 = arith.constant 1 : index
      %c0_17 = arith.constant 0 : index
      %19 = vector.load %arg4[%c0_15, %c1_16, %c0_17] : memref<4x18x16xf32, #tpu.memory_space<vmem>>, vector<4x16x16xf32>
      %c0_18 = arith.constant 0 : index
      %c0_19 = arith.constant 0 : index
      %c0_20 = arith.constant 0 : index
      %20 = vector.load %arg4[%c0_18, %c0_19, %c0_20] : memref<4x18x16xf32, #tpu.memory_space<vmem>>, vector<4x16x16xf32>
      %21 = arith.addf %19, %19 : vector<4x16x16xf32>
      %22 = arith.addf %20, %21 : vector<4x16x16xf32>
      %c0_21 = arith.constant 0 : index
      %c2_22 = arith.constant 2 : index
      %c0_23 = arith.constant 0 : index
      %23 = vector.load %arg4[%c0_21, %c2_22, %c0_23] : memref<4x18x16xf32, #tpu.memory_space<vmem>>, vector<4x16x16xf32>
      %24 = arith.addf %22, %23 : vector<4x16x16xf32>
      %cst = arith.constant 6.250000e-02 : f32
      %25 = vector.broadcast %cst : f32 to vector<4x16x16xf32>
      %26 = arith.mulf %24, %25 : vector<4x16x16xf32>
      %c0_24 = arith.constant 0 : index
      %c0_25 = arith.constant 0 : index
      %c0_26 = arith.constant 0 : index
      %27 = vector.load %arg3[%c0_24, %c0_25, %c0_26] : memref<4x16x16xf32, #tpu.memory_space<vmem>>, vector<4x16x16xf32>
      tpu.vector_store %arg3[%c0_24, %c0_25, %c0_26], %26 {strides = array<i32>} : memref<4x16x16xf32, #tpu.memory_space<vmem>>, vector<4x16x16xf32>,
      %c1_i32_27 = arith.constant 1 : i32
      %28 = arith.cmpi slt, %arg1, %c1_i32_27 : i32
      %29 = arith.extui %28 : i1 to i32
      %c0_i32_28 = arith.constant 0 : i32
      %30 = arith.cmpi ne, %29, %c0_i32_28 : i32
      scf.if %30 {
        %c0_29 = arith.constant 0 : index
        %c16 = arith.constant 16 : index
        %c1_30 = arith.constant 1 : index
        %31 = vector.load %arg5[%c0_29, %c16, %c1_30] : memref<4x18x18xf32, #tpu.memory_space<vmem>>, vector<4x1x16xf32>
        %c0_31 = arith.constant 0 : index
        %c0_32 = arith.constant 0 : index
        %c1_33 = arith.constant 1 : index
        %32 = vector.load %arg5[%c0_31, %c0_32, %c1_33] : memref<4x18x18xf32, #tpu.memory_space<vmem>>, vector<4x1x16xf32>
        tpu.vector_store %arg5[%c0_31, %c0_32, %c1_33], %31 {strides = array<i32>} : memref<4x18x18xf32, #tpu.memory_space<vmem>>, vector<4x1x16xf32>,
        %c0_34 = arith.constant 0 : index
        %c0_35 = arith.constant 0 : index
        %c0_36 = arith.constant 0 : index
        %33 = vector.load %arg2[%c0_34, %c0_35, %c0_36] : memref<4x16x16xf32, #tpu.memory_space<vmem>>, vector<4x16x16xf32>
        %c0_37 = arith.constant 0 : index
        %c1_38 = arith.constant 1 : index
        %c1_39 = arith.constant 1 : index
        %34 = vector.load %arg5[%c0_37, %c1_38, %c1_39] : memref<4x18x18xf32, #tpu.memory_space<vmem>>, vector<4x16x16xf32>
        tpu.vector_store %arg5[%c0_37, %c1_38, %c1_39], %33 {strides = array<i32>} : memref<4x18x18xf32, #tpu.memory_space<vmem>>, vector<4x16x16xf32>,
      } else {
      }
    } else {
    }
    return
  }
  func.func @transform_0(%arg0: i32, %arg1: i32) -> (i32, i32, i32) {
    %c0_i32 = arith.constant 0 : i32
    %0 = arith.minsi %arg1, %c0_i32 : i32
    %c0_i32_0 = arith.constant 0 : i32
    %c0_i32_1 = arith.constant 0 : i32
    return %arg0, %0, %c0_i32_0 : i32, i32, i32
  }
  func.func @transform_1(%arg0: i32, %arg1: i32) -> (i32, i32, i32) {
    %c1_i32 = arith.constant 1 : i32
    %0 = arith.subi %arg1, %c1_i32 : i32
    %c0_i32 = arith.constant 0 : i32
    %1 = arith.maxsi %0, %c0_i32 : i32
    %c0_i32_0 = arith.constant 0 : i32
    %c0_i32_1 = arith.constant 0 : i32
    return %arg0, %1, %c0_i32_0 : i32, i32, i32
  }
}

</mosaic_0001>

<bundles_post_ra>
// kernel: tpu_custom_call.1
= control target key start
LH: loop header
LB: loop body
LE: loop exit
PB: predicated region body
PF: predicated region fallthrough
CT: control target
= control target key end

     0   :  { %6 = vsyncpa [#allocation5], 0  ;;  %s1334_s0 = inlined_call_operand.hbm [shape: f32[8,16,16], index: 0, kind: input, shape index: {}]   ;;  %s1335_s1 = inlined_call_operand.hbm [shape: f32[8,16,16], index: 1, kind: output, shape index: {}]  }
   0x1   :  { %8 = vsyncpa [#allocation5 + $0x1], 0 }
   0x2   :  { %9 = vsyncpa [#allocation6], 0 }
   0x3   :  { %11 = vsyncpa [#allocation6 + $0x1], 0  ;;  %s1018_s6 = smov 0   ;;  %s1020_s7 = smov 0  }
   0x4   :  { %s1022_s8 = smov 0   ;;  %s1024_s9 = smov 0  }
   0x5   :  { %s1026_s10 = smov 0   ;;  %s1028_s11 = smov 0  }
   0x6   :  { %s1030_s12 = smov 0   ;;  %s1032_s13 = smov 0  }
   0x7   :  { %s1034_s14 = smov 0   ;;  %s1036_s15 = smov 0  }
   0x8   :  { %s1038_s16 = smov 0  }
   0x9 LB: > { %s700_s17 = sadd.s32 4294967295, %s995_s16   ;;  %s701_s18 = sadd.s32 4294967294, %s995_s16   ;;  %s995_s16 = sphi %s1038_s16, %s17_s16   ;;  %s991_s15 = sphi %s1036_s15, %s1355_s15   ;;  %s987_s14 = sphi %s1034_s14, %s1354_s14   ;;  %s983_s13 = sphi %s1032_s13, %s1353_s13   ;;  %s979_s12 = sphi %s1030_s12, %s1352_s12   ;;  %s975_s11 = sphi %s1028_s11, %s1351_s11   ;;  %s971_s10 = sphi %s1026_s10, %s1350_s10   ;;  %s967_s9 = sphi %s1024_s9, %s1349_s9   ;;  %s963_s8 = sphi %s1022_s8, %s1348_s8   ;;  %s959_s7 = sphi %s1020_s7, %s1347_s7   ;;  %s955_s6 = sphi %s1018_s6, %s1346_s6  }
   0xa   : > { %s26_s19 = sadd.s32 1, %s987_s14  ;;  %s29_s20 = sadd.s32 1, %s991_s15 }
   0xb   : > { %p27_p0 = scmp.ge.s32.totalorder %s26_s19, 2  ;;  %s42_s21 = sadd.s32 1, %s975_s11 }
   0xc   : > { %p49_p1 = scmp.ne.s32.totalorder %s975_s11, %s971_s10  ;;  %p50_p3 = scmp.eq.s32.totalorder %s995_s16, 0 }
   0xd   : > { %s1357_s19 = smov (%p27_p0, %s26_s19), 0  ;;  %s1359_s20 = smov (!%p27_p0, %s29_s20), %s991_s15 }
   0xe   : > { %1337 = sst [smem:[#allocation10_spill]] %s1357_s19  ;;  %p31_p2 = scmp.ge.s32.totalorder %s1359_s20, 2 }
   0xf   : > { %p55_p4 = scmp.ne.s32.totalorder %s971_s10, %s967_s9  ;;  %p1087_p5 = por %p50_p3, %p49_p1 }
  0x10   : > { %s1361_s20 = smov (%p31_p2, %s1359_s20), 0  ;;  %p56_p6 = scmp.eq.s32.totalorder %s700_s17, 0 }
  0x11   : > { %1338 = sst [smem:[#allocation11_spill]] %s1361_s20  ;;  %s37_s22 = ssub.s32 %s991_s15, %s1361_s20 }
  0x12   : > { %p40_p7 = scmp.eq.s32.totalorder %s37_s22, 0  ;;  %p1091_p8 = por %p56_p6, %p55_p4 }
  0x13   : > { %s76_s26 = sadd.s32 1, %s963_s8  ;;  %p86_p9 = scmp.ne.s32.totalorder %s963_s8, %s959_s7 }
  0x14   : > { %s1096_s25 = scalar_select %p40_p7, %s975_s11, %s42_s21  }
  0x15   : > { %p87_p10 = scmp.eq.s32.totalorder %s700_s17, 3  ;;  %p92_p12 = scmp.ne.s32.totalorder %s959_s7, %s955_s6 }
  0x16   : > { %p93_p13 = scmp.eq.s32.totalorder %s701_s18, 3  ;;  %p741_p1 = scmp.lt.s32.totalorder %s995_s16, 4 }
  0x17   : > { %p1101_p11 = por %p87_p10, %p86_p9  ;;  %s113_s29 = sand.u32 1, %s975_s11  }
  0x18   : > { %p1107_p0 = por %p93_p13, %p92_p12  ;;  %s706_s2 = sshll.u32 %s113_s29, 6 }
  0x19   : > { %s1114_s30 = scalar_select %p40_p7, %s963_s8, %s76_s26  }
  0x1a   : > { %s117_s3 = scalar_lea.vmem [#allocation4], %s706_s2  ;;  %s952_s5 = sshll.u32 %s991_s15, 6 }
  0x1b   : > { %s130_s4 = sshll.u32 %s117_s3, 4  ;;  %p1119_p2 = pnand %p741_p1, %p1087_p5  ;;  %s131_s4 = int_to_ptr.vmem [resolvable:$true] %s130_s4 }
  0x1c   : > { %s127_s21 = scalar_lea.hbm %s1334_s0, %s952_s5  ;;  %s114_s20 = scalar_lea.sflag [#allocation5], %s113_s29 }
  0x1d   : > { %s128_s22 = sshll.u32 %s127_s21, 4  ;;  %p846_p4 = pneg %p1119_p2  ;;  %s129_s22 = int_to_ptr.hbm [resolvable:$true] %s128_s22 }
  0x1e   : > { %s842_s26 = sshra.s32 %s129_s22, 4  ;;  %s849_s3 = scalar_lea.hbm %s1334_s0, 128  ;;  %s843_s26 = int_to_ptr.hbm [resolvable:$true] %s842_s26 }
  0x1f   : > { %s844_s19 = scalar_lea.hbm %s843_s26, 64 }
  0x20   : > { %p845_p3 = scmp.ne.s32.totalorder %s843_s26, %s844_s19  ;;  %p851_p5 = scmp.lt.s32.totalorder %s849_s3, %s844_s19 }
  0x22   : > { %p847_p6 = pnand %p846_p4, %p845_p3 }
  0x24   : > { %p848_p7 = pneg %p847_p6 }
  0x26   : > { %p853_p9 = pnand %p851_p5, %p848_p7 }
  0x28   : > { %856 = shalt.err (!%p853_p9)
}
  0x29   : > { %s997_s17 = smov 128   ;;  %s998_s29 = smov 8  }
  0x2a   : > { %736 = dma.hbm_to_vmem [thread:$0]  (!%p1119_p2), %s129_s22, 1024, %s131_s4, %s114_s20, %s997_s17, %s997_s17, %s998_s29  }
  0x2b   : > { %p711_p10 = scmp.ge.s32.totalorder %s995_s16, 1  ;;  %p138_p12 = scmp.lt.s32.totalorder %s995_s16, 5 }
  0x2d   : > { %p139_p13 = pnand %p711_p10, %p138_p12 }
  0x2e   : > { %s144_s5 = sand.u32 (!%p139_p13), 1, %s971_s10  }
  0x2f   : > { %142 = sbr.rel (%p139_p13) target bundleno = 699 (0x2bb), region = 24  ;;  %s712_s18 = sshll.u32 (!%p139_p13), %s144_s5, 6 }
  0x30   : > { %s145_s21 = scalar_lea.sflag (!%p139_p13), [#allocation5], %s144_s5  ;;  %s1136_s26 = scalar_lea.vmem (!%p139_p13), [#allocation4], %s712_s18 }
  0x34   : > { %945 = dma.done.wait (%p1091_p8), %s145_s21, 1024  }
  0x35   : > { %947 = vsyncadd (%p1091_p8), %s145_s21, 4294966272  ;;  %s165_s19 = sand.u32 1, %s959_s7   ;;  %p714_p1 = scmp.ne.s32.totalorder %s979_s12, 0 }
  0x36   : > { %s713_s20 = sshll.u32 %s165_s19, 6  ;;  %s999_s24 = smov (!%p714_p1), 1  }
  0x37   : > { %s1145_s4 = scalar_lea.vmem [#allocation7], %s713_s20  ;;  %180 = sbr.rel (%p714_p1) target bundleno = 194 (0xc2), region = 32 }
  0x3c   : > { %v216_v0 = vld [vmem:[%s1136_s26 + $0x10] sm:$0xff]  ;;  %v214_v1 = vld [vmem:[%s1136_s26] sm:$0xff]  ;;  %v217_v3 = vld [vmem:[%s1136_s26 + $0x18] sm:$0xff]  ;;  %vm181_vm0 = vcmask 7168   ;;  %v1000_v8 = vmov 0.0   ;;  %vm195_vm1 = vcmask 146568  }
  0x3d   : > { %234 = vrot.lane.b32.xlu1 %v216_v0, %s999_s24  ;;  %230 = vrot.lane.b32.xlu0 %v214_v1, %s999_s24  ;;  %v218_v2 = vld [vmem:[%s1136_s26 + $0x20] sm:$0xff]  ;;  %v215_v4 = vld [vmem:[%s1136_s26 + $0x8] sm:$0xff]  ;;  %186 = vst.msk [vmem:[#allocation3 + $0x18] sm:$0xff] %vm181_vm0, %v1000_v8  ;;  %vm209_vm2 = vcmask 131080   ;;  %vm254_vm3 = vcmask 138248   ;;  %vm184_vm4 = vcmask 1024  }
  0x3e   : > { %238 = vrot.lane.b32.xlu2 %v218_v2, %s999_s24  ;;  %v219_v5 = vld [vmem:[%s1136_s26 + $0x28] sm:$0xff]  ;;  %v221_v6 = vld [vmem:[%s1136_s26 + $0x38] sm:$0xff]  ;;  %v220_v7 = vld [vmem:[%s1136_s26 + $0x30] sm:$0xff]  ;;  %187 = vst.msk [vmem:[#allocation3 + $0x20] sm:$0xff] %vm181_vm0, %v1000_v8  ;;  %vm198_vm5 = vcmask 140424  }
  0x3f   : > { %200 = vst.msk [vmem:[#allocation3 + $0x18] sm:$0xff] %vm195_vm1, %v1000_v8 }
  0x40   : > { %201 = vst.msk [vmem:[#allocation3 + $0x20] sm:$0xff] %vm195_vm1, %v1000_v8 }
  0x41   : > { %211 = vst.msk [vmem:[#allocation3 + $0x18] sm:$0x1] %vm209_vm2, %v1000_v8 }
  0x42   : > { %182 = vst.msk [vmem:[#allocation3] sm:$0xff] %vm181_vm0, %v1000_v8 }
  0x43   : > { %183 = vst.msk [vmem:[#allocation3 + $0x8] sm:$0xff] %vm181_vm0, %v1000_v8 }
  0x44   : > { %189 = vst.msk [vmem:[#allocation3 + $0x30] sm:$0xff] %vm181_vm0, %v1000_v8 }
  0x45   : > { %236 = vrot.lane.b32.xlu1 %v217_v3, %s999_s24  ;;  %232 = vrot.lane.b32.xlu0 %v215_v4, %s999_s24  ;;  %190 = vst.msk [vmem:[#allocation3 + $0x38] sm:$0xff] %vm181_vm0, %v1000_v8 }
  0x46   : > { %240 = vrot.lane.b32.xlu2 %v219_v5, %s999_s24  ;;  %192 = vst.msk [vmem:[#allocation3 + $0x48] sm:$0xff] %vm181_vm0, %v1000_v8 }
  0x47   : > { %193 = vst.msk [vmem:[#allocation3 + $0x50] sm:$0xff] %vm181_vm0, %v1000_v8 }
  0x48   : > { %196 = vst.msk [vmem:[#allocation3] sm:$0xff] %vm195_vm1, %v1000_v8 }
  0x49   : > { %197 = vst.msk [vmem:[#allocation3 + $0x8] sm:$0xff] %vm195_vm1, %v1000_v8 }
  0x4a   : > { %210 = vst.msk [vmem:[#allocation3] sm:$0x1] %vm209_vm2, %v1000_v8 }
  0x4b   : > { %203 = vst.msk [vmem:[#allocation3 + $0x30] sm:$0xff] %vm195_vm1, %v1000_v8 }
  0x4c   : > { %204 = vst.msk [vmem:[#allocation3 + $0x38] sm:$0xff] %vm195_vm1, %v1000_v8 }
  0x4d   : > { %244 = vrot.lane.b32.xlu1 %v221_v6, %s999_s24  ;;  %242 = vrot.lane.b32.xlu0 %v220_v7, %s999_s24  ;;  %206 = vst.msk [vmem:[#allocation3 + $0x48] sm:$0xff] %vm195_vm1, %v1000_v8 }
  0x4e   : > { %207 = vst.msk [vmem:[#allocation3 + $0x50] sm:$0xff] %vm195_vm1, %v1000_v8 }
  0x4f   : > { %212 = vst.msk [vmem:[#allocation3 + $0x30] sm:$0x1] %vm209_vm2, %v1000_v8 }
  0x50   : > { %213 = vst.msk [vmem:[#allocation3 + $0x48] sm:$0x1] %vm209_vm2, %v1000_v8 }
  0x51   : > { %188 = vst.msk [vmem:[#allocation3 + $0x28] sm:$0x3] %vm184_vm4, %v1000_v8 }
  0x52   : > { %202 = vst.msk [vmem:[#allocation3 + $0x28] sm:$0x3] %vm198_vm5, %v1000_v8 }
  0x53   : > { %185 = vst.msk [vmem:[#allocation3 + $0x10] sm:$0x3] %vm184_vm4, %v1000_v8 }
  0x54   : > { %191 = vst.msk [vmem:[#allocation3 + $0x40] sm:$0x3] %vm184_vm4, %v1000_v8 }
  0x55   : > { %194 = vst.msk [vmem:[#allocation3 + $0x58] sm:$0x3] %vm184_vm4, %v1000_v8 }
  0x56   : > { %199 = vst.msk [vmem:[#allocation3 + $0x10] sm:$0x3] %vm198_vm5, %v1000_v8 }
  0x57   : > { %205 = vst.msk [vmem:[#allocation3 + $0x40] sm:$0x3] %vm198_vm5, %v1000_v8 }
  0x58   : > { %208 = vst.msk [vmem:[#allocation3 + $0x58] sm:$0x3] %vm198_vm5, %v1000_v8 }
  0x98   : > { %v239_v9 = vpop.permute.xlu2 %238 }
  0x99   : > { %259 = vst.msk [vmem:[#allocation3 + $0x31] sm:$0xff] %vm254_vm3, %v239_v9 }
  0xa0   : > { %v241_v10 = vpop.permute.xlu2 %240 }
  0xa1   : > { %260 = vst.msk [vmem:[#allocation3 + $0x39] sm:$0xff] %vm254_vm3, %v241_v10 }
  0xaf   : > { %v235_v11 = vpop.permute.xlu1 %234  ;;  %v231_v12 = vpop.permute.xlu0 %230 }
  0xb0   : > { %257 = vst.msk [vmem:[#allocation3 + $0x19] sm:$0xff] %vm254_vm3, %v235_v11 }
  0xb1   : > { %255 = vst.msk [vmem:[#allocation3 + $0x1] sm:$0xff] %vm254_vm3, %v231_v12 }
  0xb7   : > { %v237_v13 = vpop.permute.xlu1 %236  ;;  %v233_v14 = vpop.permute.xlu0 %232 }
  0xb8   : > { %258 = vst.msk [vmem:[#allocation3 + $0x21] sm:$0xff] %vm254_vm3, %v237_v13 }
  0xb9   : > { %256 = vst.msk [vmem:[#allocation3 + $0x9] sm:$0xff] %vm254_vm3, %v233_v14 }
  0xbf   : > { %v245_v15 = vpop.permute.xlu1 %244  ;;  %v243_v16 = vpop.permute.xlu0 %242 }
  0xc0   : > { %262 = vst.msk [vmem:[#allocation3 + $0x51] sm:$0xff] %vm254_vm3, %v245_v15 }
  0xc1   : > { %261 = vst.msk [vmem:[#allocation3 + $0x49] sm:$0xff] %vm254_vm3, %v243_v16 }
  0xc2 PF: > { %p715_p8 = scmp.le.s32.totalorder %s979_s12, 0 }
  0xc3   : > { %p716_p2 = scmp.ge.s32.totalorder (!%p715_p8), %s979_s12, 1 }
  0xc4   : > { %266 = sbr.rel (%p715_p8) target bundleno = 677 (0x2a5), region = 36 }
  0xc9   : > { %270 = sbr.rel (%p716_p2) target bundleno = 332 (0x14c), region = 40  ;;  %s1001_s9 = smov (!%p716_p2), 1  }
  0xce   : > { %v273_v17 = vld [vmem:[%s1136_s26 + $0x20] sm:$0x1]  ;;  %v274_v19 = vld [vmem:[%s1136_s26 + $0x30] sm:$0x1]  ;;  %vm291_vm6 = vcmask 131080  }
  0xcf   : > { %v271_v18 = vld [vmem:[%s1136_s26] sm:$0x1]  ;;  %283 = vrot.lane.b32.xlu1 %v273_v17, %s1001_s9  ;;  %v272_v20 = vld [vmem:[%s1136_s26 + $0x10] sm:$0x1] }
  0xd0   : > { %279 = vrot.lane.b32.xlu0 %v271_v18, %s1001_s9 }
  0xd7   : > { %285 = vrot.lane.b32.xlu1 %v274_v19, %s1001_s9 }
  0xd8   : > { %281 = vrot.lane.b32.xlu0 %v272_v20, %s1001_s9 }
 0x141   : > { %v284_v21 = vpop.permute.xlu1 %283 }
 0x142   : > { %v280_v22 = vpop.permute.xlu0 %279  ;;  %294 = vst.msk [vmem:[#allocation3 + $0x41] sm:$0x1] %vm291_vm6, %v284_v21 }
 0x143   : > { %292 = vst.msk [vmem:[#allocation3 + $0x11] sm:$0x1] %vm291_vm6, %v280_v22 }
 0x149   : > { %v286_v23 = vpop.permute.xlu1 %285 }
 0x14a   : > { %v282_v24 = vpop.permute.xlu0 %281  ;;  %295 = vst.msk [vmem:[#allocation3 + $0x59] sm:$0x1] %vm291_vm6, %v286_v23 }
 0x14b   : > { %293 = vst.msk [vmem:[#allocation3 + $0x29] sm:$0x1] %vm291_vm6, %v282_v24 }
 0x14c PF: > { %p717_p3 = scmp.ne.s32.totalorder %s979_s12, 1 }
 0x14e   : > { %299 = sbr.rel (%p717_p3) target bundleno = 344 (0x158), region = 44 }
 0x153   : > { %vm300_vm7 = vcmask 131080   ;;  %v1002_v25 = vmov 0.0  }
 0x154   : > { %301 = vst.msk [vmem:[#allocation3 + $0x11] sm:$0x1] %vm300_vm7, %v1002_v25 }
 0x155   : > { %302 = vst.msk [vmem:[#allocation3 + $0x29] sm:$0x1] %vm300_vm7, %v1002_v25 }
 0x156   : > { %303 = vst.msk [vmem:[#allocation3 + $0x41] sm:$0x1] %vm300_vm7, %v1002_v25 }
 0x157   : > { %304 = vst.msk [vmem:[#allocation3 + $0x59] sm:$0x1] %vm300_vm7, %v1002_v25 }
 0x158 PF: > { %v1185_v26 = vld [vmem:[#allocation3 + $0x20] sm:$0xff]  ;;  %s1003_s22 = smov 127   ;;  %v1193_v33 = vld [vmem:[#allocation3 + $0x18] sm:$0xff]  ;;  %v1195_v34 = vld [vmem:[#allocation3 + $0x8] sm:$0xff]  ;;  %s1004_s23 = smov 126   ;;  %vm452_vm8 = vcmask 123904  }
 0x159   : > { %v1187_v28 = vld [vmem:[#allocation3] sm:$0xff]  ;;  %v321_v29 = vadd.f32 %v1185_v26, %v1185_v26  ;;  %v320_v36 = vadd.f32 %v1193_v33, %v1193_v33  ;;  %v318_v37 = vadd.f32 %v1195_v34, %v1195_v34  ;;  %v1201_v39 = vld [vmem:[#allocation3 + $0x38] sm:$0xff]  ;;  %v1203_v40 = vld [vmem:[#allocation3 + $0x30] sm:$0xff]  ;;  %vm449_vm9 = vcmask 130048   ;;  %s1005_s2 = smov (!%p716_p2), 1  }
 0x15a   : > { %v317_v31 = vadd.f32 %v1187_v28, %v1187_v28  ;;  %v324_v42 = vadd.f32 %v1201_v39, %v1201_v39  ;;  %v323_v43 = vadd.f32 %v1203_v40, %v1203_v40  ;;  %v1209_v45 = vld [vmem:[#allocation3 + $0x50] sm:$0xff]  ;;  %v1211_v46 = vld [vmem:[#allocation3 + $0x48] sm:$0xff] }
 0x15b   : > { %v307_v27 = vld [vmem:[#allocation3 + $0x10] sm:$0x3]  ;;  %349 = vrot.lane.b32.xlu2 %v321_v29, %s1003_s22  ;;  %v327_v48 = vadd.f32 %v1209_v45, %v1209_v45  ;;  %v326_v49 = vadd.f32 %v1211_v46, %v1211_v46 }
 0x15c   : > { %v319_v30 = vadd.f32 %v307_v27, %v307_v27  ;;  %341 = vrot.lane.b32.xlu0 %v317_v31, %s1003_s22  ;;  %v310_v32 = vld [vmem:[#allocation3 + $0x28] sm:$0x3] }
 0x15d   : > { %v322_v35 = vadd.f32 %v310_v32, %v310_v32  ;;  %v313_v38 = vld [vmem:[#allocation3 + $0x40] sm:$0x3] }
 0x15e   : > { %345 = vrot.lane.b32.xlu1 %v319_v30, %s1003_s22  ;;  %v325_v41 = vadd.f32 %v313_v38, %v313_v38  ;;  %v316_v44 = vld [vmem:[#allocation3 + $0x58] sm:$0x3] }
 0x15f   : > { %v328_v47 = vadd.f32 %v316_v44, %v316_v44 }
 0x163   : > { %351 = vrot.lane.b32.xlu2 %v322_v35, %s1003_s22 }
 0x164   : > { %343 = vrot.lane.b32.xlu0 %v318_v37, %s1003_s22 }
 0x166   : > { %347 = vrot.lane.b32.xlu1 %v320_v36, %s1003_s22 }
 0x16b   : > { %357 = vrot.lane.b32.xlu2 %v325_v41, %s1003_s22 }
 0x16c   : > { %353 = vrot.lane.b32.xlu0 %v323_v43, %s1003_s22 }
 0x16e   : > { %355 = vrot.lane.b32.xlu1 %v324_v42, %s1003_s22 }
 0x173   : > { %363 = vrot.lane.b32.xlu2 %v328_v47, %s1003_s22 }
 0x174   : > { %359 = vrot.lane.b32.xlu0 %v326_v49, %s1003_s22 }
 0x176   : > { %361 = vrot.lane.b32.xlu1 %v327_v48, %s1003_s22 }
 0x17b   : > { %405 = vrot.lane.b32.xlu2 %v307_v27, %s1004_s23 }
 0x17c   : > { %401 = vrot.lane.b32.xlu0 %v1187_v28, %s1004_s23 }
 0x17e   : > { %403 = vrot.lane.b32.xlu1 %v1195_v34, %s1004_s23 }
 0x183   : > { %411 = vrot.lane.b32.xlu2 %v310_v32, %s1004_s23 }
 0x184   : > { %407 = vrot.lane.b32.xlu0 %v1193_v33, %s1004_s23 }
 0x186   : > { %409 = vrot.lane.b32.xlu1 %v1185_v26, %s1004_s23 }
 0x18b   : > { %417 = vrot.lane.b32.xlu2 %v313_v38, %s1004_s23 }
 0x18c   : > { %413 = vrot.lane.b32.xlu0 %v1203_v40, %s1004_s23 }
 0x18e   : > { %415 = vrot.lane.b32.xlu1 %v1201_v39, %s1004_s23 }
 0x193   : > { %423 = vrot.lane.b32.xlu2 %v316_v44, %s1004_s23 }
 0x194   : > { %419 = vrot.lane.b32.xlu0 %v1211_v46, %s1004_s23 }
 0x196   : > { %421 = vrot.lane.b32.xlu1 %v1209_v45, %s1004_s23 }
 0x1b5   : > { %v350_v50 = vpop.permute.xlu2 %349 }
 0x1b6   : > { %v381_v16 = vadd.f32 %v350_v50, %v1185_v26 }
 0x1bd   : > { %v352_v51 = vpop.permute.xlu2 %351 }
 0x1be   : > { %v382_v61 = vadd.f32 %v352_v51, %v310_v32 }
 0x1c5   : > { %v358_v52 = vpop.permute.xlu2 %357 }
 0x1c6   : > { %v385_v2 = vadd.f32 %v358_v52, %v313_v38 }
 0x1cd   : > { %v364_v53 = vpop.permute.xlu2 %363 }
 0x1ce   : > { %v342_v55 = vpop.permute.xlu0 %341  ;;  %v388_v7 = vadd.f32 %v364_v53, %v316_v44 }
 0x1cf   : > { %v377_v9 = vadd.f32 %v342_v55, %v1187_v28 }
 0x1d0   : > { %v346_v54 = vpop.permute.xlu1 %345 }
 0x1d1   : > { %v379_v56 = vadd.f32 %v346_v54, %v307_v27 }
 0x1d5   : > { %v406_v57 = vpop.permute.xlu2 %405 }
 0x1d6   : > { %v439_v59 = vadd.f32 %v406_v57, %v379_v56  ;;  %v344_v60 = vpop.permute.xlu0 %343 }
 0x1d7   : > { %v378_v8 = vadd.f32 %v344_v60, %v1195_v34 }
 0x1d8   : > { %v348_v58 = vpop.permute.xlu1 %347  ;;  %453 = vst.msk [vmem:[#allocation2 + $0x10] sm:$0x3] %vm452_vm8, %v439_v59 }
 0x1d9   : > { %v380_v17 = vadd.f32 %v348_v58, %v1193_v33 }
 0x1dd   : > { %v412_v62 = vpop.permute.xlu2 %411 }
 0x1de   : > { %v442_v0 = vadd.f32 %v412_v62, %v382_v61  ;;  %v354_v1 = vpop.permute.xlu0 %353 }
 0x1df   : > { %v383_v32 = vadd.f32 %v354_v1, %v1203_v40 }
 0x1e0   : > { %v356_v63 = vpop.permute.xlu1 %355  ;;  %456 = vst.msk [vmem:[#allocation2 + $0x28] sm:$0x3] %vm452_vm8, %v442_v0 }
 0x1e1   : > { %v384_v30 = vadd.f32 %v356_v63, %v1201_v39 }
 0x1e5   : > { %v418_v3 = vpop.permute.xlu2 %417 }
 0x1e6   : > { %v445_v5 = vadd.f32 %v418_v3, %v385_v2  ;;  %v360_v6 = vpop.permute.xlu0 %359 }
 0x1e7   : > { %v386_v56 = vadd.f32 %v360_v6, %v1211_v46 }
 0x1e8   : > { %v362_v4 = vpop.permute.xlu1 %361  ;;  %459 = vst.msk [vmem:[#allocation2 + $0x40] sm:$0x3] %vm452_vm8, %v445_v5 }
 0x1e9   : > { %v387_v53 = vadd.f32 %v362_v4, %v1209_v45 }
 0x1ed   : > { %v424_v10 = vpop.permute.xlu2 %423 }
 0x1ee   : > { %v448_v12 = vadd.f32 %v424_v10, %v388_v7  ;;  %v402_v14 = vpop.permute.xlu0 %401 }
 0x1ef   : > { %v437_v15 = vadd.f32 %v402_v14, %v377_v9 }
 0x1f0   : > { %v404_v11 = vpop.permute.xlu1 %403  ;;  %462 = vst.msk [vmem:[#allocation2 + $0x58] sm:$0x3] %vm452_vm8, %v448_v12 }
 0x1f1   : > { %v438_v13 = vadd.f32 %v404_v11, %v378_v8  ;;  %450 = vst.msk [vmem:[#allocation2] sm:$0xff] %vm449_vm9, %v437_v15 }
 0x1f3   : > { %451 = vst.msk [vmem:[#allocation2 + $0x8] sm:$0xff] %vm449_vm9, %v438_v13 }
 0x1f6   : > { %v408_v20 = vpop.permute.xlu0 %407 }
 0x1f7   : > { %v440_v21 = vadd.f32 %v408_v20, %v380_v17 }
 0x1f8   : > { %v410_v18 = vpop.permute.xlu1 %409  ;;  %v471_v29 = vld [vmem:[#allocation2] sm:$0xff] }
 0x1f9   : > { %v441_v19 = vadd.f32 %v410_v18, %v381_v16  ;;  %454 = vst.msk [vmem:[#allocation2 + $0x18] sm:$0xff] %vm449_vm9, %v440_v21 }
 0x1fa   : > { %v464_v22 = vld [vmem:[#allocation2 + $0x9] sm:$0xff]  ;;  %v463_v24 = vld [vmem:[#allocation2 + $0x1] sm:$0xff] }
 0x1fb   : > { %455 = vst.msk [vmem:[#allocation2 + $0x20] sm:$0xff] %vm449_vm9, %v441_v19  ;;  %v480_v23 = vadd.f32 %v464_v22, %v464_v22  ;;  %v472_v25 = vld [vmem:[#allocation2 + $0x8] sm:$0xff]  ;;  %v479_v27 = vadd.f32 %v463_v24, %v463_v24 }
 0x1fc   : > { %v496_v26 = vld [vmem:[#allocation2 + $0xa] sm:$0xff]  ;;  %v495_v34 = vld [vmem:[#allocation2 + $0x2] sm:$0xff] }
 0x1fd   : > { %v488_v28 = vadd.f32 %v480_v23, %v472_v25  ;;  %v487_v31 = vadd.f32 %v479_v27, %v471_v29 }
 0x1fe   : > { %v414_v38 = vpop.permute.xlu0 %413 }
 0x1ff   : > { %v504_v33 = vadd.f32 %v496_v26, %v488_v28  ;;  %v503_v36 = vadd.f32 %v495_v34, %v487_v31  ;;  %v443_v43 = vadd.f32 %v414_v38, %v383_v32 }
 0x200   : > { %v416_v35 = vpop.permute.xlu1 %415  ;;  %v473_v50 = vld [vmem:[#allocation2 + $0x18] sm:$0xff] }
 0x201   : > { %v444_v37 = vadd.f32 %v416_v35, %v384_v30  ;;  %v512_v41 = vmul.f32 0.0625, %v504_v33  ;;  %v511_v44 = vmul.f32 0.0625, %v503_v36  ;;  %457 = vst.msk [vmem:[#allocation2 + $0x30] sm:$0xff] %vm449_vm9, %v443_v43 }
 0x202   : > { %v466_v42 = vld [vmem:[#allocation2 + $0x21] sm:$0xff]  ;;  %v465_v48 = vld [vmem:[#allocation2 + $0x19] sm:$0xff] }
 0x203   : > { %v482_v47 = vadd.f32 %v466_v42, %v466_v42  ;;  %458 = vst.msk [vmem:[#allocation2 + $0x38] sm:$0xff] %vm449_vm9, %v444_v37  ;;  %v474_v39 = vld [vmem:[#allocation2 + $0x20] sm:$0xff]  ;;  %v481_v49 = vadd.f32 %v465_v48, %v465_v48 }
 0x204   : > { %520 = vst.msk [vmem:[%s1145_s4 + $0x8] sm:$0xff] %vm449_vm9, %v512_v41  ;;  %v498_v51 = vld [vmem:[#allocation2 + $0x22] sm:$0xff]  ;;  %v497_v55 = vld [vmem:[#allocation2 + $0x1a] sm:$0xff] }
 0x205   : > { %519 = vst.msk [vmem:[%s1145_s4] sm:$0xff] %vm449_vm9, %v511_v44  ;;  %v490_v40 = vadd.f32 %v482_v47, %v474_v39  ;;  %v489_v52 = vadd.f32 %v481_v49, %v473_v50 }
 0x206   : > { %v420_v61 = vpop.permute.xlu0 %419 }
 0x207   : > { %v506_v54 = vadd.f32 %v498_v51, %v490_v40  ;;  %v505_v57 = vadd.f32 %v497_v55, %v489_v52  ;;  %v446_v0 = vadd.f32 %v420_v61, %v386_v56 }
 0x208   : > { %v422_v58 = vpop.permute.xlu1 %421  ;;  %v475_v6 = vld [vmem:[#allocation2 + $0x30] sm:$0xff] }
 0x209   : > { %v514_v59 = vmul.f32 0.0625, %v506_v54  ;;  %v447_v60 = vadd.f32 %v422_v58, %v387_v53  ;;  %v513_v62 = vmul.f32 0.0625, %v505_v57  ;;  %460 = vst.msk [vmem:[#allocation2 + $0x48] sm:$0xff] %vm449_vm9, %v446_v0 }
 0x20a   : > { %v468_v63 = vld [vmem:[#allocation2 + $0x39] sm:$0xff]  ;;  %v467_v3 = vld [vmem:[#allocation2 + $0x31] sm:$0xff] }
 0x20b   : > { %522 = vst.msk [vmem:[%s1145_s4 + $0x18] sm:$0xff] %vm449_vm9, %v514_v59  ;;  %v484_v1 = vadd.f32 %v468_v63, %v468_v63  ;;  %v476_v2 = vld [vmem:[#allocation2 + $0x38] sm:$0xff]  ;;  %v483_v4 = vadd.f32 %v467_v3, %v467_v3 }
 0x20c   : > { %521 = vst.msk [vmem:[%s1145_s4 + $0x10] sm:$0xff] %vm449_vm9, %v513_v62  ;;  %v500_v46 = vld [vmem:[#allocation2 + $0x3a] sm:$0xff]  ;;  %v499_v9 = vld [vmem:[#allocation2 + $0x32] sm:$0xff] }
 0x20d   : > { %v492_v45 = vadd.f32 %v484_v1, %v476_v2  ;;  %461 = vst.msk [vmem:[#allocation2 + $0x50] sm:$0xff] %vm449_vm9, %v447_v60  ;;  %v491_v7 = vadd.f32 %v483_v4, %v475_v6 }
 0x20f   : > { %v508_v5 = vadd.f32 %v500_v46, %v492_v45  ;;  %v507_v10 = vadd.f32 %v499_v9, %v491_v7 }
 0x210   : > { %v477_v18 = vld [vmem:[#allocation2 + $0x48] sm:$0xff] }
 0x211   : > { %v516_v8 = vmul.f32 0.0625, %v508_v5  ;;  %v515_v11 = vmul.f32 0.0625, %v507_v10 }
 0x213   : > { %524 = vst.msk [vmem:[%s1145_s4 + $0x28] sm:$0xff] %vm449_vm9, %v516_v8 }
 0x214   : > { %v470_v12 = vld [vmem:[#allocation2 + $0x51] sm:$0xff]  ;;  %v469_v14 = vld [vmem:[#allocation2 + $0x49] sm:$0xff]  ;;  %523 = vst.msk [vmem:[%s1145_s4 + $0x20] sm:$0xff] %vm449_vm9, %v515_v11 }
 0x215   : > { %v486_v13 = vadd.f32 %v470_v12, %v470_v12  ;;  %v478_v15 = vld [vmem:[#allocation2 + $0x50] sm:$0xff]  ;;  %v485_v16 = vadd.f32 %v469_v14, %v469_v14 }
 0x216   : > { %v502_v19 = vld [vmem:[#allocation2 + $0x52] sm:$0xff]  ;;  %v501_v22 = vld [vmem:[#allocation2 + $0x4a] sm:$0xff] }
 0x217   : > { %v494_v17 = vadd.f32 %v486_v13, %v478_v15  ;;  %v493_v20 = vadd.f32 %v485_v16, %v477_v18 }
 0x219   : > { %v510_v21 = vadd.f32 %v502_v19, %v494_v17  ;;  %v509_v23 = vadd.f32 %v501_v22, %v493_v20 }
 0x21a   : > { %529 = sbr.rel (%p716_p2) target bundleno = 677 (0x2a5), region = 48 }
 0x21b   : > { %v518_v24 = vmul.f32 0.0625, %v510_v21  ;;  %v517_v25 = vmul.f32 0.0625, %v509_v23 }
 0x21d   : > { %526 = vst.msk [vmem:[%s1145_s4 + $0x38] sm:$0xff] %vm449_vm9, %v518_v24 }
 0x21e   : > { %525 = vst.msk [vmem:[%s1145_s4 + $0x30] sm:$0xff] %vm449_vm9, %v517_v25 }
 0x21f   : > { %v541_v27 = vld [vmem:[%s1136_s26 + $0x10] sm:$0xff]  ;;  %v539_v28 = vld [vmem:[%s1136_s26] sm:$0xff]  ;;  %v542_v30 = vld [vmem:[%s1136_s26 + $0x18] sm:$0xff]  ;;  %vm534_vm10 = vcmask 131080   ;;  %vm579_vm11 = vcmask 138248  }
 0x220   : > { %559 = vrot.lane.b32.xlu1 %v541_v27, %s1005_s2  ;;  %555 = vrot.lane.b32.xlu0 %v539_v28, %s1005_s2  ;;  %v543_v29 = vld [vmem:[%s1136_s26 + $0x20] sm:$0xff]  ;;  %v540_v26 = vld [vmem:[%s1136_s26 + $0x8] sm:$0xff]  ;;  %v530_v35 = vld [vmem:[#allocation3 + $0x10] sm:$0x1] }
 0x221   : > { %563 = vrot.lane.b32.xlu2 %v543_v29, %s1005_s2  ;;  %v544_v31 = vld [vmem:[%s1136_s26 + $0x28] sm:$0xff]  ;;  %v546_v32 = vld [vmem:[%s1136_s26 + $0x38] sm:$0xff]  ;;  %v545_v33 = vld [vmem:[%s1136_s26 + $0x30] sm:$0xff]  ;;  %535 = vst.msk [vmem:[#allocation3] sm:$0x1] %vm534_vm10, %v530_v35 }
 0x222   : > { %v531_v34 = vld [vmem:[#allocation3 + $0x28] sm:$0x1]  ;;  %v532_v37 = vld [vmem:[#allocation3 + $0x40] sm:$0x1]  ;;  %v533_v38 = vld [vmem:[#allocation3 + $0x58] sm:$0x1] }
 0x223   : > { %536 = vst.msk [vmem:[#allocation3 + $0x18] sm:$0x1] %vm534_vm10, %v531_v34 }
 0x224   : > { %537 = vst.msk [vmem:[#allocation3 + $0x30] sm:$0x1] %vm534_vm10, %v532_v37 }
 0x225   : > { %538 = vst.msk [vmem:[#allocation3 + $0x48] sm:$0x1] %vm534_vm10, %v533_v38 }
 0x228   : > { %561 = vrot.lane.b32.xlu1 %v542_v30, %s1005_s2  ;;  %557 = vrot.lane.b32.xlu0 %v540_v26, %s1005_s2 }
 0x229   : > { %565 = vrot.lane.b32.xlu2 %v544_v31, %s1005_s2 }
 0x230   : > { %569 = vrot.lane.b32.xlu1 %v546_v32, %s1005_s2  ;;  %567 = vrot.lane.b32.xlu0 %v545_v33, %s1005_s2 }
 0x27b   : > { %v564_v36 = vpop.permute.xlu2 %563 }
 0x27c   : > { %584 = vst.msk [vmem:[#allocation3 + $0x31] sm:$0xff] %vm579_vm11, %v564_v36 }
 0x283   : > { %v566_v41 = vpop.permute.xlu2 %565 }
 0x284   : > { %585 = vst.msk [vmem:[#allocation3 + $0x39] sm:$0xff] %vm579_vm11, %v566_v41 }
 0x292   : > { %v560_v42 = vpop.permute.xlu1 %559  ;;  %v556_v43 = vpop.permute.xlu0 %555 }
 0x293   : > { %582 = vst.msk [vmem:[#allocation3 + $0x19] sm:$0xff] %vm579_vm11, %v560_v42 }
 0x294   : > { %580 = vst.msk [vmem:[#allocation3 + $0x1] sm:$0xff] %vm579_vm11, %v556_v43 }
 0x29a   : > { %v562_v44 = vpop.permute.xlu1 %561  ;;  %v558_v47 = vpop.permute.xlu0 %557 }
 0x29b   : > { %583 = vst.msk [vmem:[#allocation3 + $0x21] sm:$0xff] %vm579_vm11, %v562_v44 }
 0x29c   : > { %581 = vst.msk [vmem:[#allocation3 + $0x9] sm:$0xff] %vm579_vm11, %v558_v47 }
 0x2a2   : > { %v570_v48 = vpop.permute.xlu1 %569  ;;  %v568_v39 = vpop.permute.xlu0 %567 }
 0x2a3   : > { %587 = vst.msk [vmem:[#allocation3 + $0x51] sm:$0xff] %vm579_vm11, %v570_v48 }
 0x2a4   : > { %586 = vst.msk [vmem:[#allocation3 + $0x49] sm:$0xff] %vm579_vm11, %v568_v39 }
 0x2a5 PF: > { %s720_s3 = sadd.s32 4294967295, %s979_s12  ;;  %s728_s17 = sshll.u32 %s983_s13, 3 }
 0x2a6   : > { %p597_p4 = scmp.gt.s32.totalorder %s720_s3, 0  ;;  %s607_s29 = sshll.u32 %s1145_s4, 4  ;;  %s608_s29 = int_to_ptr.vmem [resolvable:$true] %s607_s29 }
 0x2a7   : > { %s589_s22 = scalar_lea.sflag [#allocation6], %s165_s19  ;;  %s892_s2 = scalar_lea.hbm %s1335_s1, 128 }
 0x2a8   : > { %s1363_s3 = smov (!%p597_p4, %s720_s3), 0 }
 0x2a9   : > { %s722_s5 = sshll.u32 %s1363_s3, 1 }
 0x2aa   : > { %s604_s18 = sadd.s32 %s728_s17, %s722_s5 }
 0x2ab   : > { %s724_s21 = sshll.u32 %s604_s18, 3 }
 0x2ac   : > { %s606_s24 = scalar_lea.hbm %s1335_s1, %s724_s21 }
 0x2ad   : > { %s609_s9 = sshll.u32 %s606_s24, 4  ;;  %s610_s9 = int_to_ptr.hbm [resolvable:$true] %s609_s9 }
 0x2ae   : > { %s886_s23 = sshra.s32 %s610_s9, 4  ;;  %s887_s23 = int_to_ptr.hbm [resolvable:$true] %s886_s23 }
 0x2af   : > { %s888_s12 = scalar_lea.hbm %s887_s23, 64  ;;  %p893_p9 = scmp.lt.s32.totalorder %s887_s23, %s1335_s1 }
 0x2b0   : > { %p889_p6 = scmp.ne.s32.totalorder %s887_s23, %s888_s12  ;;  %p894_p10 = scmp.lt.s32.totalorder %s892_s2, %s888_s12 }
 0x2b2   : > { %p890_p7 = pnand %p889_p6, %p1101_p11  ;;  %p895_p12 = por %p894_p10, %p893_p9 }
 0x2b4   : > { %p891_p5 = pneg %p890_p7 }
 0x2b6   : > { %p896_p13 = pnand %p895_p12, %p891_p5 }
 0x2b8   : > { %899 = shalt.err (!%p896_p13)
}
 0x2b9   : > { %s1006_s19 = smov 128   ;;  %s1007_s5 = smov 8  }
 0x2ba   : > { %731 = dma.vmem_to_hbm [thread:$0]  (%p1101_p11), %s608_s29, 1024, %s610_s9, %s589_s22, %s1006_s19, %s1006_s19, %s1007_s5  }
 0x2bb PF: > { %p742_p1 = scmp.ge.s32.totalorder %s995_s16, 2  ;;  %s624_s18 = sand.u32 1, %s955_s6  }
 0x2bc   : > { %s625_s21 = scalar_lea.sflag [#allocation6], %s624_s18 }
 0x2bd   : > { %p738_p8 = pnand %p742_p1, %p1107_p0 }
 0x2bf   : > { %p739_p2 = pneg %p738_p8 }
 0x2c1   : > { %949 = dma.done.wait (%p739_p2), %s625_s21, 1024  }
 0x2c2   : > { %951 = vsyncadd (%p739_p2), %s625_s21, 4294966272  ;;  %s17_s16 = sadd.s32 1, %s995_s16   ;;  %s1344_s27 = sld [smem:[#allocation10_spill]] }
 0x2c3   : > { %p14_p3 = scmp.ge.s32.totalorder %s17_s16, 6   ;;  %s1345_s29 = sld [smem:[#allocation11_spill]] }
 0x2c4   : > { %s1346_s6 = smov %s959_s7  ;;  %s1347_s7 = smov %s963_s8 }
 0x2c5   : > { %s1348_s8 = smov %s1114_s30  ;;  %s1349_s9 = smov %s971_s10 }
 0x2c6   : > { %s1350_s10 = smov %s975_s11  ;;  %s1351_s11 = smov %s1096_s25 }
 0x2c7   : > { %s1352_s12 = smov %s987_s14  ;;  %s1353_s13 = smov %s991_s15 }
 0x2c8   : > { %s1354_s14 = smov %s1344_s27  ;;  %16 = sbr.rel (!%p14_p3) target bundleno = 9 (0x9), region = 89 }
 0x2c9   : > { %s1355_s15 = smov %s1345_s29 }
 0x2cd   :  { %631 = vsyncpa [#allocation5], 1 }
 0x2ce   :  { %633 = vsyncpa [#allocation5 + $0x1], 1 }
 0x2cf   :  { %634 = vsyncpa [#allocation6], 1 }
 0x2d0   :  { %636 = vsyncpa [#allocation6 + $0x1], 1 }

</bundles_post_ra>
